<compile_context>
chip_gen: v5e
topology: v5e:2x2
jax: 0.10.0
libtpu: 0.0.40
codegen_flags: <defaults>
</compile_context>

<pallas_src>
import jax
import jax.numpy as jnp
from jax.experimental import pallas as pl
from jax.experimental.pallas import tpu as pltpu


# Sweepable: 512-2048 keeps the kernel out of the per-step-overhead regime
# while staying far below scoped-VMEM limits on v5e/v6e/v7x.
DEFAULT_ROW_TILE = 512


def _ffn_kernel(x_ref, w1_ref, b1_ref, w2_ref, b2_ref, o_ref):
    # x_ref: (TM, H) bf16   w1_ref: (H, FF) bf16   b1_ref: (1, FF) f32
    # w2_ref: (FF, H) bf16  b2_ref: (1, H) f32     o_ref: (TM, H) out_dtype
    x = x_ref[...]

    # First Linear (MXU, f32 accumulate) + bias + ReLU on the VPU in f32.
    h = jnp.dot(x, w1_ref[...], preferred_element_type=jnp.float32) + b1_ref[...]
    h = jnp.maximum(h, 0.0)

    # TODO(synk): nn.Dropout between the layers is identity in eval mode;
    # training-mode dropout would be done in-kernel with pltpu.prng_seed +
    # pltpu.prng_random_bits rather than a second HBM pass.

    # Second Linear (MXU, f32 accumulate). bf16 rhs promotes exactly to f32;
    # default precision keeps the single-pass MXU path (no f32 emulation).
    y = jnp.dot(h, w2_ref[...], preferred_element_type=jnp.float32) + b2_ref[...]

    # TODO(synk): H=32 output fills 32/128 lanes (masked vst); only repack or
    # transpose to a lane-dense layout if profiling shows the store slot or a
    # wall-minus-compute gap dominating.
    o_ref[...] = y.astype(o_ref.dtype)


def _pick_row_tile(n_rows: int, default: int = DEFAULT_ROW_TILE) -> int:
    """Row tile: big enough to amortize step overhead, >=2 grid steps when
    possible (v7x megacore), sublane (8) aligned."""
    if n_rows <= 8:
        # Single full-extent block (block dim equal to the array dim is legal).
        return n_rows
    if n_rows <= default:
        half = pl.cdiv(n_rows, 2)
        return min(default, ((half + 7) // 8) * 8)
    return default


def ffn_pallas(x, params, *, row_tile=None, storage_dtype=jnp.bfloat16,
               out_dtype=jnp.float32):
    """x: (B, S, H). params: wf_t (H, FF), bf (1, FF), w2_t (FF, H), b2 (1, H).

    Weights are pre-transposed to (in, out), so the kernel computes
    x @ W1^T + b1 -> ReLU -> @ W2^T + b2, identical to the PyTorch FFN.
    """
    B, S, H = x.shape
    FF = params["wf_t"].shape[1]
    N = B * S

    # bf16 storage for the big operands (ideally x already arrives in
    # storage_dtype so this cast is a no-op); biases stay f32 (tiny).
    x2d = x.reshape(N, H).astype(storage_dtype)
    w1 = params["wf_t"].astype(storage_dtype)
    w2 = params["w2_t"].astype(storage_dtype)
    b1 = params["bf"].astype(jnp.float32)
    b2 = params["b2"].astype(jnp.float32)

    if row_tile is None:
        row_tile = _pick_row_tile(N)

    # No pad / slice: ragged last block is masked by Pallas (rows independent).
    grid = (pl.cdiv(N, row_tile),)

    out2d = pl.pallas_call(
        _ffn_kernel,
        out_shape=jax.ShapeDtypeStruct((N, H), out_dtype),
        grid_spec=pltpu.PrefetchScalarGridSpec(
            num_scalar_prefetch=0,
            grid=grid,
            in_specs=[
                pl.BlockSpec((row_tile, H), lambda i: (i, 0)),  # x rows
                pl.BlockSpec((H, FF), lambda i: (0, 0)),        # W1^T (resident)
                pl.BlockSpec((1, FF), lambda i: (0, 0)),        # b1 (resident)
                pl.BlockSpec((FF, H), lambda i: (0, 0)),        # W2^T (resident)
                pl.BlockSpec((1, H), lambda i: (0, 0)),         # b2 (resident)
            ],
            out_specs=pl.BlockSpec((row_tile, H), lambda i: (i, 0)),
        ),
        compiler_params=pltpu.CompilerParams(
            dimension_semantics=("parallel",)),
    )(x2d, w1, b1, w2, b2)

    return out2d.reshape(B, S, H)


def ffn_reference(x, params, storage_dtype=jnp.bfloat16):
    """Pure-JAX reference mirroring the kernel's bf16-storage / f32-accumulate
    numerics (PyTorch FFN forward, eval mode)."""
    cast = lambda a: a.astype(storage_dtype).astype(jnp.float32)
    h = jnp.maximum(cast(x) @ cast(params["wf_t"]) + params["bf"], 0.0)
    return h @ cast(params["w2_t"]) + params["b2"]


def init_params(key, hidden, ff):
    ks = jax.random.split(key, 4)
    scale = 0.02
    return {
        # Linear weights pre-transposed to (in, out): x @ W_t + b == x @ W.T + b.
        "wf_t": jax.random.normal(ks[0], (hidden, ff), jnp.float32) * scale,
        "bf":   jax.random.normal(ks[1], (1, ff), jnp.float32) * scale,
        "w2_t": jax.random.normal(ks[2], (ff, hidden), jnp.float32) * scale,
        "b2":   jax.random.normal(ks[3], (1, hidden), jnp.float32) * scale,
    }


if __name__ == "__main__":
    # Config: HIDDEN_SIZE=32, FF_SIZE=4*HIDDEN_SIZE=128, DROPOUT_R (eval -> identity)
    B, S, H, FF = 2, 8, 32, 128

    key = jax.random.PRNGKey(0)
    k_param, k_x = jax.random.split(key, 2)

    params = init_params(k_param, H, FF)
    x = jax.random.normal(k_x, (B, S, H), jnp.float32)

    out = ffn_pallas(x, params)
    out = jax.block_until_ready(out)

    ref = ffn_reference(x, params)
    assert out.shape == (B, S, H)
    assert jnp.allclose(out, ref, atol=1e-3, rtol=1e-3), "mismatch vs reference"

    print("KERNEL_OK")
</pallas_src>

<mosaic_0001>
module attributes {stable_mosaic.version = 11 : i64} {
  func.func @_ffn_kernel(%arg0: i32, %arg1: memref<8x32xbf16, #tpu.memory_space<vmem>>, %arg2: memref<32x128xbf16, #tpu.memory_space<vmem>>, %arg3: memref<1x128xf32, #tpu.memory_space<vmem>>, %arg4: memref<128x32xbf16, #tpu.memory_space<vmem>>, %arg5: memref<1x32xf32, #tpu.memory_space<vmem>>, %arg6: memref<8x32xf32, #tpu.memory_space<vmem>>) attributes {dimension_semantics = [#tpu.dimension_semantics<parallel>], iteration_bounds = array<i64: 2>, scalar_prefetch = 0 : i64, scratch_operands = 0 : i64, tpu.core_type = #tpu.core_type<tc>, window_params = [{transform_indices = @transform_0, window_bounds = array<i64: 8, 32>}, {pipeline_mode = #tpu.pipeline_mode<synchronous>, transform_indices = @transform_1, window_bounds = array<i64: 32, 128>}, {pipeline_mode = #tpu.pipeline_mode<synchronous>, transform_indices = @transform_2, window_bounds = array<i64: 1, 128>}, {pipeline_mode = #tpu.pipeline_mode<synchronous>, transform_indices = @transform_3, window_bounds = array<i64: 128, 32>}, {pipeline_mode = #tpu.pipeline_mode<synchronous>, transform_indices = @transform_4, window_bounds = array<i64: 1, 32>}, {transform_indices = @transform_5, window_bounds = array<i64: 8, 32>}]} {
    %c0 = arith.constant 0 : index
    %c0_0 = arith.constant 0 : index
    %0 = vector.load %arg1[%c0, %c0_0] : memref<8x32xbf16, #tpu.memory_space<vmem>>, vector<8x32xbf16>
    %c0_1 = arith.constant 0 : index
    %c0_2 = arith.constant 0 : index
    %1 = vector.load %arg2[%c0_1, %c0_2] : memref<32x128xbf16, #tpu.memory_space<vmem>>, vector<32x128xbf16>
    %cst = arith.constant dense<0.000000e+00> : vector<8x128xf32>
    %2 = tpu.matmul %0, %1, %cst {dimension_numbers = #tpu.dot_dimension_numbers<[1], [0], [0], [1], [0, 0, 1, 1], [], []>} : vector<8x32xbf16>, vector<32x128xbf16>, vector<8x128xf32> -> vector<8x128xf32>
    %c0_3 = arith.constant 0 : index
    %c0_4 = arith.constant 0 : index
    %3 = vector.load %arg3[%c0_3, %c0_4] : memref<1x128xf32, #tpu.memory_space<vmem>>, vector<1x128xf32>
    %4 = vector.broadcast %3 : vector<1x128xf32> to vector<8x128xf32>
    %5 = arith.addf %2, %4 : vector<8x128xf32>
    %cst_5 = arith.constant 0.000000e+00 : f32
    %6 = vector.broadcast %cst_5 : f32 to vector<8x128xf32>
    %7 = arith.maximumf %5, %6 : vector<8x128xf32>
    %c0_6 = arith.constant 0 : index
    %c0_7 = arith.constant 0 : index
    %8 = vector.load %arg4[%c0_6, %c0_7] : memref<128x32xbf16, #tpu.memory_space<vmem>>, vector<128x32xbf16>
    %cst_8 = arith.constant dense<0.000000e+00> : vector<8x32xf32>
    %9 = tpu.matmul %7, %8, %cst_8 {dimension_numbers = #tpu.dot_dimension_numbers<[1], [0], [0], [1], [0, 0, 1, 1], [], []>} : vector<8x128xf32>, vector<128x32xbf16>, vector<8x32xf32> -> vector<8x32xf32>
    %c0_9 = arith.constant 0 : index
    %c0_10 = arith.constant 0 : index
    %10 = vector.load %arg5[%c0_9, %c0_10] : memref<1x32xf32, #tpu.memory_space<vmem>>, vector<1x32xf32>
    %11 = vector.broadcast %10 : vector<1x32xf32> to vector<8x32xf32>
    %12 = arith.addf %9, %11 : vector<8x32xf32>
    %c0_11 = arith.constant 0 : index
    %c0_12 = arith.constant 0 : index
    %13 = vector.load %arg6[%c0_11, %c0_12] : memref<8x32xf32, #tpu.memory_space<vmem>>, vector<8x32xf32>
    tpu.vector_store %arg6[%c0_11, %c0_12], %12 {strides = array<i32>} : memref<8x32xf32, #tpu.memory_space<vmem>>, vector<8x32xf32>,
    return
  }
  func.func @transform_0(%arg0: i32) -> (i32, i32) {
    %c0_i32 = arith.constant 0 : i32
    %c0_i32_0 = arith.constant 0 : i32
    return %arg0, %c0_i32 : i32, i32
  }
  func.func @transform_1(%arg0: i32) -> (i32, i32) {
    %c0_i32 = arith.constant 0 : i32
    %c0_i32_0 = arith.constant 0 : i32
    %c0_i32_1 = arith.constant 0 : i32
    return %c0_i32, %c0_i32_0 : i32, i32
  }
  func.func @transform_2(%arg0: i32) -> (i32, i32) {
    %c0_i32 = arith.constant 0 : i32
    %c0_i32_0 = arith.constant 0 : i32
    %c0_i32_1 = arith.constant 0 : i32
    return %c0_i32, %c0_i32_0 : i32, i32
  }
  func.func @transform_3(%arg0: i32) -> (i32, i32) {
    %c0_i32 = arith.constant 0 : i32
    %c0_i32_0 = arith.constant 0 : i32
    %c0_i32_1 = arith.constant 0 : i32
    return %c0_i32, %c0_i32_0 : i32, i32
  }
  func.func @transform_4(%arg0: i32) -> (i32, i32) {
    %c0_i32 = arith.constant 0 : i32
    %c0_i32_0 = arith.constant 0 : i32
    %c0_i32_1 = arith.constant 0 : i32
    return %c0_i32, %c0_i32_0 : i32, i32
  }
  func.func @transform_5(%arg0: i32) -> (i32, i32) {
    %c0_i32 = arith.constant 0 : i32
    %c0_i32_0 = arith.constant 0 : i32
    return %arg0, %c0_i32 : i32, i32
  }
}

</mosaic_0001>

<bundles_post_ra>
// kernel: tpu_custom_call.1
= control target key start
LH: loop header
LB: loop body
LE: loop exit
PB: predicated region body
PF: predicated region fallthrough
CT: control target
= control target key end

     0   :  { %10 = vsyncpa [#allocation3], 0  ;;  %s735_s0 = inlined_call_operand.vmem [shape: bf16[16,32], index: 0, kind: input, shape index: {}]   ;;  %s736_s1 = inlined_call_operand.vmem [shape: bf16[32,128], index: 1, kind: input, shape index: {}]   ;;  %s737_s2 = inlined_call_operand.vmem [shape: f32[1,128], index: 2, kind: input, shape index: {}]   ;;  %s738_s3 = inlined_call_operand.vmem [shape: bf16[128,32], index: 3, kind: input, shape index: {}]   ;;  %s739_s4 = inlined_call_operand.vmem [shape: f32[1,32], index: 4, kind: input, shape index: {}]   ;;  %s740_s5 = inlined_call_operand.hbm [shape: f32[16,32], index: 5, kind: output, shape index: {}]  }
   0x1   :  { %12 = vsyncpa [#allocation3 + $0x1], 0  ;;  %s612_s18 = smov 0   ;;  %s614_s19 = smov 0  }
   0x2   :  { %s616_s20 = smov 0   ;;  %s618_s21 = smov 0  }
   0x3 LB: > { %s633_s22 = sadd.s32 4294967295, %s580_s21   ;;  %s416_s23 = sadd.s32 4294967294, %s580_s21   ;;  %s580_s21 = sphi %s618_s21, %s746_s21   ;;  %s576_s20 = sphi %s616_s20, %s745_s20   ;;  %s572_s19 = sphi %s614_s19, %s744_s19   ;;  %s568_s18 = sphi %s612_s18, %s743_s18  }
   0x4   : > { %s637_s24 = sadd.s32 1, %s580_s21   ;;  %s135_s25 = sadd.s32 1, %s576_s20 }
   0x5   : > { %s132_s26 = ssub.s32 %s580_s21, %s637_s24  ;;  %p145_p0 = scmp.ne.s32.totalorder %s576_s20, %s572_s19 }
   0x6   : > { %p133_p1 = scmp.eq.s32.totalorder %s132_s26, 0  ;;  %p146_p2 = scmp.eq.s32.totalorder %s633_s22, 1 }
   0x7   : > { %p151_p3 = scmp.ne.s32.totalorder %s572_s19, %s568_s18  ;;  %p152_p4 = scmp.eq.s32.totalorder %s416_s23, 1 }
   0x8   : > { %s648_s27 = scalar_select %p133_p1, %s576_s20, %s135_s25  }
   0x9   : > { %p650_p5 = por %p146_p2, %p145_p0  ;;  %p654_p6 = por %p152_p4, %p151_p3 }
   0xa   : > { %p419_p7 = scmp.ge.s32.totalorder %s580_s21, 1  ;;  %p189_p8 = scmp.lt.s32.totalorder %s580_s21, 3 }
   0xc   : > { %p190_p9 = pnand %p419_p7, %p189_p8 }
   0xd   : > { %p216_p10 = scmp.lt.s32.totalorder (!%p190_p9), %s633_s22, 1  ;;  %s213_s16 = sand.u32 (!%p190_p9), 1, %s572_s19  }
   0xe   : > { %193 = sbr.rel (%p190_p9) target bundleno = 288 (0x120), region = 40  ;;  %s464_s23 = sshll.u32 (!%p190_p9), %s633_s22, 3 }
   0xf   : > { %s352_s30 = scalar_lea.hbm (!%p190_p9), %s740_s5, %s464_s23  ;;  %s538_s15 = scalar_lea.hbm (!%p190_p9), %s740_s5, 16 }
  0x10   : > { %s356_s10 = sshll.u32 (!%p190_p9), %s352_s30, 4  ;;  %s357_s10 = int_to_ptr.hbm [resolvable:$true] %s356_s10 }
  0x13   : > { %v468_v0 = vld [vmem:[%s736_s1 + $0x8] sm:$0xff]  ;;  %v476_v1 = vld [vmem:[%s738_s3 + $0x38] sm:$0xff]  ;;  %v467_v2 = vld [vmem:[%s736_s1] sm:$0xff]  ;;  %s217_s11 = scalar_select %p216_p10, %s633_s22, 1  ;;  %vm242_vm0 = vcmask 261120  }
  0x14   : > { %252 = vmatpush.bf16.msra.mxu0 %v468_v0  ;;  %328 = vmatpush.bf16.msra.mxu1 %v476_v1  ;;  %v475_v3 = vld [vmem:[%s738_s3 + $0x30] sm:$0xff]  ;;  %v474_v5 = vld [vmem:[%s738_s3 + $0x28] sm:$0xff]  ;;  %v473_v6 = vld [vmem:[%s738_s3 + $0x20] sm:$0xff]  ;;  %s532_s22 = sshra.s32 %s357_s10, 4  ;;  %s533_s22 = int_to_ptr.hbm [resolvable:$true] %s532_s22 }
  0x15   : > { %s421_s14 = sshll.u32 %s217_s11, 2  ;;  %v472_v7 = vld [vmem:[%s738_s3 + $0x18] sm:$0xff]  ;;  %v471_v8 = vld [vmem:[%s738_s3 + $0x10] sm:$0xff]  ;;  %v470_v9 = vld [vmem:[%s738_s3 + $0x8] sm:$0xff]  ;;  %s342_s11 = scalar_lea.sflag [#allocation3], %s213_s16 }
  0x16   : > { %s219_s17 = scalar_lea.vmem %s735_s0, %s421_s14  ;;  %v469_v10 = vld [vmem:[%s738_s3] sm:$0xff]  ;;  %s534_s12 = scalar_lea.hbm %s533_s22, 8 }
  0x17   : > { %v221_v4 = vld [vmem:[%s219_s17] sm:$0xf]  ;;  %s420_s17 = sshll.u32 %s213_s16, 3  ;;  %p535_p11 = scmp.ne.s32.totalorder %s533_s22, %s534_s12 }
  0x18   : > { %253 = vmatpush.bf16.msra.mxu0 %v467_v2  ;;  %329 = vmatpush.bf16.msra.mxu1 %v475_v3  ;;  %v516_v11 = vld [vmem:[%s737_s2] ss:$0 sm:$0xff]  ;;  %s215_s8 = scalar_lea.vmem [#allocation2], %s420_s17  ;;  %p539_p0 = scmp.lt.s32.totalorder %s533_s22, %s740_s5 }
  0x19   : > { %v517_v16 = vld [vmem:[%s739_s4] ss:$0 sm:$0xff]  ;;  %s354_s9 = sshll.u32 %s215_s8, 4  ;;  %p536_p12 = pnand %p535_p11, %p650_p5  ;;  %s355_s9 = int_to_ptr.vmem [resolvable:$true] %s354_s9 }
  0x1a   : > { %p540_p1 = scmp.lt.s32.totalorder %s538_s15, %s534_s12 }
  0x1b   : > { %430 = vmatmul.msk.bf16.vlgmr.msra.gmra.mxu0 %vm242_vm0, %v221_v4  ;;  %p537_p13 = pneg %p536_p12 }
  0x1c   : > { %330 = vmatpush.bf16.msra.mxu1 %v474_v5  ;;  %p541_p2 = por %p540_p1, %p539_p0 }
  0x1e   : > { %p542_p3 = pnand %p541_p2, %p537_p13 }
  0x20   : > { %331 = vmatpush.bf16.msra.mxu1 %v473_v6 }
  0x24   : > { %332 = vmatpush.bf16.msra.mxu1 %v472_v7 }
  0x28   : > { %333 = vmatpush.bf16.msra.mxu1 %v471_v8 }
  0x2c   : > { %334 = vmatpush.bf16.msra.mxu1 %v470_v9 }
  0x30   : > { %335 = vmatpush.bf16.msra.mxu1 %v469_v10 }
  0x98   : > { %v255_v12 = vpop.f32.mrf.mxu0 }
  0x99   : > { %v256_v13 = vadd.f32 %v516_v11, %v255_v12 }
  0x9b   : > { %v259_v14 = vmax.f32 %v256_v13, 0.0 }
  0x9d   : > { %336 = vmatmul.f32.vlgmr.msra.gmra.mxu1 %v259_v14 }
  0xa0   : > { %v257_v15 = vpop.f32.mrf.mxu0 }
 0x11a   : > { %v337_v17 = vpop.f32.mrf.mxu1 }
 0x11b   : > { %v338_v18 = vadd.f32 %v517_v16, %v337_v17 }
 0x11d   : > { %340 = vst.msk [vmem:[%s215_s8] sm:$0xff] %vm242_vm0, %v338_v18 }
 0x11e   : > { %545 = shalt.err (!%p542_p3)
}
 0x11f   : > { %477 = dma.vmem_to_hbm [thread:$0]  (%p650_p5), %s355_s9, 128, %s357_s10, %s342_s11  }
 0x120 PF: > { %p483_p4 = scmp.ge.s32.totalorder %s580_s21, 2  ;;  %s368_s16 = sand.u32 1, %s568_s18  }
 0x121   : > { %s369_s25 = scalar_lea.sflag [#allocation3], %s368_s16 }
 0x122   : > { %p480_p7 = pnand %p483_p4, %p654_p6 }
 0x124   : > { %p481_p8 = pneg %p480_p7 }
 0x126   : > { %563 = dma.done.wait (%p481_p8), %s369_s25, 128  }
 0x127   : > { %565 = vsyncadd (%p481_p8), %s369_s25, 4294967168  ;;  %p15_p9 = scmp.ge.s32.totalorder %s637_s24, 4   ;;  %s743_s18 = smov %s572_s19 }
 0x128   : > { %s744_s19 = smov %s576_s20  ;;  %s745_s20 = smov %s648_s27 }
 0x129   : > { %s746_s21 = smov %s637_s24  ;;  %17 = sbr.rel (!%p15_p9) target bundleno = 3 (0x3), region = 75 }
 0x12e   :  { %375 = vsyncpa [#allocation3], 1 }
 0x12f   :  { %377 = vsyncpa [#allocation3 + $0x1], 1 }

</bundles_post_ra>
